<compile_context>
chip_gen: v7x
topology: tpu7x:2x2x1
jax: 0.10.0
libtpu: 0.0.40
codegen_flags: <defaults>
</compile_context>

<pallas_src>
import jax
import jax.numpy as jnp
from jax.experimental import pallas as pl
from jax.experimental.pallas import tpu as pltpu


def _round8(n):
    return (n + 7) // 8 * 8


def _init_params(key, input_size, n_hid_units, output_size, n_lags):
    """Deterministic synthetic parameter init (shapes match the PyTorch module).

    NOTE (PyTorch import): a real Conv1d weight has shape (out, in, K) with
    cross-correlation semantics; the expected layout here is
    wconv[k, c_in, c_out] == torch_weight[c_out, c_in, k].
    Linear weights (out, in) must be transposed to (in, out).
    """
    K = 2 * n_lags + 1
    k1, k2, k3, k4, k5, k6 = jax.random.split(key, 6)
    wconv = 0.1 * jax.random.normal(k1, (K, input_size, n_hid_units), jnp.float32)
    bconv = 0.1 * jax.random.normal(k2, (1, n_hid_units), jnp.float32)
    w1 = 0.1 * jax.random.normal(k3, (n_hid_units, n_hid_units), jnp.float32)
    b1 = 0.1 * jax.random.normal(k4, (1, n_hid_units), jnp.float32)
    w2 = 0.1 * jax.random.normal(k5, (n_hid_units, output_size), jnp.float32)
    b2 = 0.1 * jax.random.normal(k6, (1, output_size), jnp.float32)
    return wconv, bconv, w1, b1, w2, b2


def pack_params(params):
    """Pack all decoder parameters into one (R, ncols) f32 buffer -> single DMA.

    Segment layout (every segment start is a multiple of 8 rows so in-kernel static
    slices stay sublane-aligned):
      o_wc : conv weight in im2col layout, row (k*C_in + c) -> wconv[k, c, :]   (K*C_in, H)
      o_bc : conv bias                                                           (1, H)
      o_w1 : dense_layer_01 weight                                               (H, H)
      o_b1 : dense_layer_01 bias                                                 (1, H)
      o_w2 : dense_layer_02 weight (cols >= O are zero)                          (H, O)
      o_b2 : dense_layer_02 bias                                                 (1, O)
    """
    wconv, bconv, w1, b1, w2, b2 = params
    K, C_in, H = wconv.shape
    O = w2.shape[1]
    ncols = max(H, O)

    def seg(a):
        r, c = a.shape
        return jnp.pad(a.astype(jnp.float32), ((0, _round8(r) - r), (0, ncols - c)))

    pieces = [seg(wconv.reshape(K * C_in, H)), seg(bconv), seg(w1), seg(b1), seg(w2), seg(b2)]
    offs = []
    r = 0
    for p in pieces:
        offs.append(r)
        r += p.shape[0]
    packed = jnp.concatenate(pieces, axis=0)
    dims = dict(K=K, C_in=C_in, H=H, O=O, ncols=ncols, n_rows=r,
                o_wc=offs[0], o_bc=offs[1], o_w1=offs[2],
                o_b1=offs[3], o_w2=offs[4], o_b2=offs[5])
    return packed, dims


def decoder_forward(x, packed_params, dims, n_lags, *, t_blk=128,
                    compute_dtype=jnp.float32):
    """x: (T, input_size) float32. Returns (mean_prediction (T, output_size), None).

    compute_dtype=jnp.bfloat16 uses the bf16-native MXU path on v6e/v7x (f32 accumulation).
    """
    T, C_in = x.shape
    K, H, O = dims["K"], dims["H"], dims["O"]
    assert C_in == dims["C_in"]
    o_wc, o_bc, o_w1 = dims["o_wc"], dims["o_bc"], dims["o_w1"]
    o_b1, o_w2, o_b2 = dims["o_b1"], dims["o_w2"], dims["o_b2"]

    n_blocks = -(-T // t_blk)
    T_pad = n_blocks * t_blk
    # Halo ('same' conv padding) + round T up to a multiple of t_blk.
    # TODO(synk): at very large T, fold this pad into per-block boundary masking in-kernel.
    xpad = jnp.pad(x, ((n_lags, n_lags + (T_pad - T)), (0, 0)))

    def kernel(x_ref, p_ref, out_ref):
        i = pl.program_id(0)
        base = pl.multiple_of(i * t_blk, t_blk)

        # --- Conv1d as a single im2col matmul (1 MXU push instead of K) ---------------
        taps = [x_ref[pl.ds(base + k, t_blk), :] for k in range(K)]
        lhs = jnp.concatenate(taps, axis=1).astype(compute_dtype)        # (t_blk, K*C_in)

        w_conv = p_ref[o_wc:o_wc + K * C_in, :H].astype(compute_dtype)   # (K*C_in, H)
        b_conv = p_ref[o_bc:o_bc + 1, :H]                                # (1, H) f32
        w1 = p_ref[o_w1:o_w1 + H, :H].astype(compute_dtype)              # (H, H)
        b1 = p_ref[o_b1:o_b1 + 1, :H]                                    # (1, H)
        w2 = p_ref[o_w2:o_w2 + H, :O].astype(compute_dtype)              # (H, O)
        b2 = p_ref[o_b2:o_b2 + 1, :O]                                    # (1, O)

        h = jnp.dot(lhs, w_conv, preferred_element_type=jnp.float32) + b_conv
        h = jnp.maximum(h, 0.0)                                          # ReLU

        # --- dense_layer_01 + ReLU ----------------------------------------------------
        h = jnp.dot(h.astype(compute_dtype), w1, preferred_element_type=jnp.float32) + b1
        h = jnp.maximum(h, 0.0)

        # --- dense_layer_02 (gaussian noise dist -> no final activation) ---------------
        y = jnp.dot(h.astype(compute_dtype), w2, preferred_element_type=jnp.float32) + b2
        out_ref[...] = y.astype(out_ref.dtype)

    out = pl.pallas_call(
        kernel,
        out_shape=jax.ShapeDtypeStruct((T_pad, O), jnp.float32),
        grid=(n_blocks,),
        in_specs=[
            # Full padded input resident in VMEM (constant block index -> DMA'd once).
            pl.BlockSpec(xpad.shape, lambda i: (0, 0)),
            # All weights/biases in one resident buffer (single DMA for 6 tensors).
            pl.BlockSpec(packed_params.shape, lambda i: (0, 0)),
        ],
        out_specs=pl.BlockSpec((t_blk, O), lambda i: (i, 0)),
        compiler_params=pltpu.CompilerParams(
            # Time blocks are independent -> shard across v7x's 2 TensorCores.
            dimension_semantics=("parallel",),
        ),
    )(xpad, packed_params)

    if T_pad != T:
        out = out[:T]
    return out, None  # y (precision matrix) only exists for noise_dist='gaussian-full'


def _reference_forward(x, params, n_lags):
    """Pure-JAX f32 reference (original K-shifted-matmul formulation, independent of im2col)."""
    wconv, bconv, w1, b1, w2, b2 = params
    T = x.shape[0]
    K = wconv.shape[0]
    xpad = jnp.pad(x, ((n_lags, n_lags), (0, 0)))
    acc = sum(xpad[k:k + T, :] @ wconv[k] for k in range(K)) + bconv
    h = jax.nn.relu(acc)
    h = jax.nn.relu(h @ w1 + b1)
    return h @ w2 + b2


if __name__ == "__main__":
    # hparams (Decoder with model_type='ff'):
    T = 512           # time (batched into 128-row blocks over the grid)
    input_size = 16   # neurons
    n_hid_units = 32
    output_size = 8
    n_lags = 2
    # TODO(synk): 'lstm' model_type raises NotImplementedError in the reference; not implemented.
    # TODO(synk): 'gaussian-full' precision_sqrt / bmm branch not exercised (gaussian noise dist).

    key = jax.random.PRNGKey(0)
    kx, kp = jax.random.split(key)
    x = jax.random.normal(kx, (T, input_size), jnp.float32)
    params = _init_params(kp, input_size, n_hid_units, output_size, n_lags)
    packed, dims = pack_params(params)

    ref = _reference_forward(x, params, n_lags)

    # f32 path (matches PyTorch f32 semantics; works on all generations).
    out, y = decoder_forward(x, packed, dims, n_lags, t_blk=128,
                             compute_dtype=jnp.float32)
    out = jax.block_until_ready(out)
    assert out.shape == (T, output_size)
    assert y is None
    assert jnp.allclose(out, ref, atol=1e-4, rtol=1e-4), "f32 kernel mismatch vs JAX reference"

    # bf16 matmul path (recommended on v6e/v7x bf16-native MXU; f32 accumulation).
    out_bf16, _ = decoder_forward(x, packed, dims, n_lags, t_blk=128,
                                  compute_dtype=jnp.bfloat16)
    out_bf16 = jax.block_until_ready(out_bf16)
    assert jnp.allclose(out_bf16, ref, atol=5e-2, rtol=5e-2), "bf16 kernel mismatch vs reference"

    print("KERNEL_OK")
</pallas_src>

<mosaic_0001>
module attributes {stable_mosaic.version = 11 : i64} {
  func.func @kernel(%arg0: i32, %arg1: memref<516x16xf32, #tpu.memory_space<vmem>>, %arg2: memref<168x32xf32, #tpu.memory_space<vmem>>, %arg3: memref<128x8xf32, #tpu.memory_space<vmem>>) attributes {dimension_semantics = [#tpu.dimension_semantics<parallel>], iteration_bounds = array<i64: 4>, scalar_prefetch = 0 : i64, scratch_operands = 0 : i64, tpu.core_type = #tpu.core_type<tc>, window_params = [{pipeline_mode = #tpu.pipeline_mode<synchronous>, transform_indices = @transform_0, window_bounds = array<i64: 516, 16>}, {pipeline_mode = #tpu.pipeline_mode<synchronous>, transform_indices = @transform_1, window_bounds = array<i64: 168, 32>}, {transform_indices = @transform_2, window_bounds = array<i64: 128, 8>}]} {
    %c128_i32 = arith.constant 128 : i32
    %0 = arith.muli %arg0, %c128_i32 : i32
    %1 = tpu.assume_multiple %0, 128 : i32
    %c0_i32 = arith.constant 0 : i32
    %2 = arith.addi %1, %c0_i32 : i32
    %3 = arith.index_cast %2 : i32 to index
    %c0 = arith.constant 0 : index
    %4 = vector.load %arg1[%3, %c0] : memref<516x16xf32, #tpu.memory_space<vmem>>, vector<128x16xf32>
    %c1_i32 = arith.constant 1 : i32
    %5 = arith.addi %1, %c1_i32 : i32
    %6 = arith.index_cast %5 : i32 to index
    %c0_0 = arith.constant 0 : index
    %7 = vector.load %arg1[%6, %c0_0] : memref<516x16xf32, #tpu.memory_space<vmem>>, vector<128x16xf32>
    %c2_i32 = arith.constant 2 : i32
    %8 = arith.addi %1, %c2_i32 : i32
    %9 = arith.index_cast %8 : i32 to index
    %c0_1 = arith.constant 0 : index
    %10 = vector.load %arg1[%9, %c0_1] : memref<516x16xf32, #tpu.memory_space<vmem>>, vector<128x16xf32>
    %c3_i32 = arith.constant 3 : i32
    %11 = arith.addi %1, %c3_i32 : i32
    %12 = arith.index_cast %11 : i32 to index
    %c0_2 = arith.constant 0 : index
    %13 = vector.load %arg1[%12, %c0_2] : memref<516x16xf32, #tpu.memory_space<vmem>>, vector<128x16xf32>
    %c4_i32 = arith.constant 4 : i32
    %14 = arith.addi %1, %c4_i32 : i32
    %15 = arith.index_cast %14 : i32 to index
    %c0_3 = arith.constant 0 : index
    %16 = vector.load %arg1[%15, %c0_3] : memref<516x16xf32, #tpu.memory_space<vmem>>, vector<128x16xf32>
    %17 = tpu.concatenate %4, %7, %10, %13, %16 in 1 : vector<128x16xf32>, vector<128x16xf32>, vector<128x16xf32>, vector<128x16xf32>, vector<128x16xf32> -> vector<128x80xf32>
    %c0_4 = arith.constant 0 : index
    %c0_5 = arith.constant 0 : index
    %18 = vector.load %arg2[%c0_4, %c0_5] : memref<168x32xf32, #tpu.memory_space<vmem>>, vector<80x32xf32>
    %c80 = arith.constant 80 : index
    %c0_6 = arith.constant 0 : index
    %19 = vector.load %arg2[%c80, %c0_6] : memref<168x32xf32, #tpu.memory_space<vmem>>, vector<1x32xf32>
    %c88 = arith.constant 88 : index
    %c0_7 = arith.constant 0 : index
    %20 = vector.load %arg2[%c88, %c0_7] : memref<168x32xf32, #tpu.memory_space<vmem>>, vector<32x32xf32>
    %c120 = arith.constant 120 : index
    %c0_8 = arith.constant 0 : index
    %21 = vector.load %arg2[%c120, %c0_8] : memref<168x32xf32, #tpu.memory_space<vmem>>, vector<1x32xf32>
    %c128 = arith.constant 128 : index
    %c0_9 = arith.constant 0 : index
    %22 = vector.load %arg2[%c128, %c0_9] : memref<168x32xf32, #tpu.memory_space<vmem>>, vector<32x8xf32>
    %c160 = arith.constant 160 : index
    %c0_10 = arith.constant 0 : index
    %23 = vector.load %arg2[%c160, %c0_10] : memref<168x32xf32, #tpu.memory_space<vmem>>, vector<1x8xf32>
    %cst = arith.constant dense<0.000000e+00> : vector<128x32xf32>
    %24 = tpu.matmul %17, %18, %cst {dimension_numbers = #tpu.dot_dimension_numbers<[1], [0], [0], [1], [0, 0, 1, 1], [], []>} : vector<128x80xf32>, vector<80x32xf32>, vector<128x32xf32> -> vector<128x32xf32>
    %25 = vector.broadcast %19 : vector<1x32xf32> to vector<128x32xf32>
    %26 = arith.addf %24, %25 : vector<128x32xf32>
    %cst_11 = arith.constant 0.000000e+00 : f32
    %27 = vector.broadcast %cst_11 : f32 to vector<128x32xf32>
    %28 = arith.maximumf %26, %27 : vector<128x32xf32>
    %cst_12 = arith.constant dense<0.000000e+00> : vector<128x32xf32>
    %29 = tpu.matmul %28, %20, %cst_12 {dimension_numbers = #tpu.dot_dimension_numbers<[1], [0], [0], [1], [0, 0, 1, 1], [], []>} : vector<128x32xf32>, vector<32x32xf32>, vector<128x32xf32> -> vector<128x32xf32>
    %30 = vector.broadcast %21 : vector<1x32xf32> to vector<128x32xf32>
    %31 = arith.addf %29, %30 : vector<128x32xf32>
    %cst_13 = arith.constant 0.000000e+00 : f32
    %32 = vector.broadcast %cst_13 : f32 to vector<128x32xf32>
    %33 = arith.maximumf %31, %32 : vector<128x32xf32>
    %cst_14 = arith.constant dense<0.000000e+00> : vector<128x8xf32>
    %34 = tpu.matmul %33, %22, %cst_14 {dimension_numbers = #tpu.dot_dimension_numbers<[1], [0], [0], [1], [0, 0, 1, 1], [], []>} : vector<128x32xf32>, vector<32x8xf32>, vector<128x8xf32> -> vector<128x8xf32>
    %35 = vector.broadcast %23 : vector<1x8xf32> to vector<128x8xf32>
    %36 = arith.addf %34, %35 : vector<128x8xf32>
    %c0_15 = arith.constant 0 : index
    %c0_16 = arith.constant 0 : index
    %37 = vector.load %arg3[%c0_15, %c0_16] : memref<128x8xf32, #tpu.memory_space<vmem>>, vector<128x8xf32>
    tpu.vector_store %arg3[%c0_15, %c0_16], %36 {strides = array<i32>} : memref<128x8xf32, #tpu.memory_space<vmem>>, vector<128x8xf32>,
    return
  }
  func.func @transform_0(%arg0: i32) -> (i32, i32) {
    %c0_i32 = arith.constant 0 : i32
    %c0_i32_0 = arith.constant 0 : i32
    %c0_i32_1 = arith.constant 0 : i32
    return %c0_i32, %c0_i32_0 : i32, i32
  }
  func.func @transform_1(%arg0: i32) -> (i32, i32) {
    %c0_i32 = arith.constant 0 : i32
    %c0_i32_0 = arith.constant 0 : i32
    %c0_i32_1 = arith.constant 0 : i32
    return %c0_i32, %c0_i32_0 : i32, i32
  }
  func.func @transform_2(%arg0: i32) -> (i32, i32) {
    %c0_i32 = arith.constant 0 : i32
    %c0_i32_0 = arith.constant 0 : i32
    return %arg0, %c0_i32 : i32, i32
  }
}

</mosaic_0001>

<bundles_post_ra>
// kernel: tpu_custom_call.1
= control target key start
LH: loop header
LB: loop body
LE: loop exit
PB: predicated region body
PF: predicated region fallthrough
CT: control target
= control target key end

     0   :  { %s1640_s9 = smov 0   ;;  %s2034_s0 = inlined_call_operand.vmem [shape: f32[516,16], index: 0, kind: input, shape index: {}]   ;;  %s2035_s1 = inlined_call_operand.vmem [shape: f32[168,32], index: 1, kind: input, shape index: {}]   ;;  %s2036_s2 = inlined_call_operand.vmem [shape: f32[512,8], index: 2, kind: output, shape index: {}]  }
   0x1 LB: > { %s1259_s10 = sadd.s32 4294967295, %s1619_s9   ;;  %p1262_p0 = scmp.ge.s32.totalorder %s1619_s9, 1  ;;  %s1619_s9 = sphi %s1640_s9, %s12_s9  }
   0x2   : > { %p102_p1 = scmp.lt.s32.totalorder %s1619_s9, 5 }
   0x4   : > { %p103_p2 = pnand %p1262_p0, %p102_p1 }
   0x5   : > { %s1265_s11 = sshll.u32 (!%p103_p2), %s1259_s10, 7  ;;  %v539_v0 = vld [vmem:[%s2035_s1] sm:$0xff] (!%p103_p2)  ;;  %v540_v1 = vld [vmem:[%s2035_s1 + $0x8] sm:$0xff] (!%p103_p2)  ;;  %v541_v2 = vld [vmem:[%s2035_s1 + $0x10] sm:$0xff] (!%p103_p2)  ;;  %s1621_s23 = smov (!%p103_p2), 32   ;;  %vm471_vm0 = vcmask (!%p103_p2), 130048  }
   0x6   : > { %106 = sbr.rel (%p103_p2) target bundleno = 902 (0x386), region = 28  ;;  %s1662_s20 = scalar_lea.vmem (!%p103_p2), %s2034_s0, %s1265_s11  ;;  %v1561_v3 = vpack.c.bf16 (!%p103_p2), %v540_v1, %v539_v0  ;;  %v542_v4 = vld [vmem:[%s2035_s1 + $0x18] sm:$0xff] (!%p103_p2)  ;;  %v543_v8 = vld [vmem:[%s2035_s1 + $0x20] sm:$0xff] (!%p103_p2)  ;;  %v544_v9 = vld [vmem:[%s2035_s1 + $0x28] sm:$0xff] (!%p103_p2)  ;;  %vm488_vm1 = vcmask (!%p103_p2), 261120   ;;  %vm505_vm2 = vcmask (!%p103_p2), 392192  }
   0x7   : > { %v1284_v5 = vld [vmem:[%s1662_s20 + $0x2] sm:$0xff] (!%p103_p2)  ;;  %v1565_v7 = vpack.c.bf16 (!%p103_p2), %v542_v4, %v541_v2  ;;  %s1622_s24 = smov (!%p103_p2), 16   ;;  %v1285_v10 = vld [vmem:[%s1662_s20 + $0xa] sm:$0xff] (!%p103_p2)  ;;  %v1569_v12 = vpack.c.bf16 (!%p103_p2), %v544_v9, %v543_v8  ;;  %s1623_s29 = smov (!%p103_p2), 48   ;;  %v1270_v17 = vld [vmem:[%s1662_s20 + $0x19] sm:$0xff] (!%p103_p2)  ;;  %vm522_vm3 = vcmask (!%p103_p2), 523264  }
   0x8   : > { %v1267_v6 = vld [vmem:[%s1662_s20 + $0x1] sm:$0xff] (!%p103_p2)  ;;  %295 = vrot.lane.b32.xlu1 (!%p103_p2), %v1284_v5, %s1621_s23  ;;  %v1268_v11 = vld [vmem:[%s1662_s20 + $0x9] sm:$0xff] (!%p103_p2)  ;;  %1562 = vmatprep.subr.bf16.mxu0 (!%p103_p2), %v1561_v3  ;;  %v1269_v15 = vld [vmem:[%s1662_s20 + $0x11] sm:$0xff] (!%p103_p2)  ;;  %s1624_s30 = smov (!%p103_p2), 64   ;;  %vm564_vm4 = vcmask (!%p103_p2), 654336   ;;  %s1263_s5 = sshll.u32 (!%p103_p2), %s1259_s10, 4 }
   0x9   : > { %231 = vrot.lane.b32.xlu0 (!%p103_p2), %v1267_v6, %s1622_s24  ;;  %1564 = vmatpush3.bf16.msra.mxu0 (!%p103_p2), %v1561_v3  ;;  %v1302_v13 = vld [vmem:[%s1662_s20 + $0xb] sm:$0xff] (!%p103_p2)  ;;  %v1301_v14 = vld [vmem:[%s1662_s20 + $0x3] sm:$0xff] (!%p103_p2)  ;;  %v1287_v19 = vld [vmem:[%s1662_s20 + $0x1a] sm:$0xff] (!%p103_p2)  ;;  %p120_p3 = scmp.lt.s32.totalorder (!%p103_p2), %s1263_s5, 63  ;;  %vm1184_vm5 = vcmask (!%p103_p2), 64512  }
   0xa   : > { %1566 = vmatprep.subr.bf16.mxu0 (!%p103_p2), %v1565_v7  ;;  %v1318_v16 = vld [vmem:[%s1662_s20 + $0x4] sm:$0xff] (!%p103_p2)  ;;  %v1319_v18 = vld [vmem:[%s1662_s20 + $0xc] sm:$0xff] (!%p103_p2)  ;;  %v1304_v21 = vld [vmem:[%s1662_s20 + $0x1b] sm:$0xff] (!%p103_p2) }
   0xb   : > { %v1286_v20 = vld [vmem:[%s1662_s20 + $0x12] sm:$0xff] (!%p103_p2)  ;;  %v547_v26 = vld [vmem:[%s2035_s1 + $0x40] sm:$0xff] (!%p103_p2)  ;;  %v548_v27 = vld [vmem:[%s2035_s1 + $0x48] sm:$0xff] (!%p103_p2) }
   0xc   : > { %297 = vrot.lane.b32.xlu1 (!%p103_p2), %v1285_v10, %s1621_s23  ;;  %v1303_v22 = vld [vmem:[%s1662_s20 + $0x13] sm:$0xff] (!%p103_p2)  ;;  %v1271_v28 = vld [vmem:[%s1662_s20 + $0x21] sm:$0xff] (!%p103_p2)  ;;  %v1577_v30 = vpack.c.bf16 (!%p103_p2), %v548_v27, %v547_v26  ;;  %v1272_v31 = vld [vmem:[%s1662_s20 + $0x29] sm:$0xff] (!%p103_p2) }
   0xd   : > { %233 = vrot.lane.b32.xlu0 %v1268_v11, %s1622_s24  ;;  %1568 = vmatpush3.bf16.msra.mxu0 %v1565_v7  ;;  %v545_v23 = vld [vmem:[%s2035_s1 + $0x30] sm:$0xff]  ;;  %v546_v24 = vld [vmem:[%s2035_s1 + $0x38] sm:$0xff]  ;;  %v1288_v34 = vld [vmem:[%s1662_s20 + $0x22] sm:$0xff]  ;;  %s2038_s5 = smov (!%p120_p3, %s1263_s5), 63 }
   0xe   : > { %1570 = vmatprep.subr.bf16.mxu0 %v1569_v12  ;;  %v1573_v25 = vpack.c.bf16 %v546_v24, %v545_v23  ;;  %v1320_v29 = vld [vmem:[%s1662_s20 + $0x14] sm:$0xff]  ;;  %v1321_v32 = vld [vmem:[%s1662_s20 + $0x1c] sm:$0xff]  ;;  %v1289_v33 = vld [vmem:[%s1662_s20 + $0x2a] sm:$0xff]  ;;  %s1264_s6 = sshll.u32 %s2038_s5, 3 }
   0xf   : > { %v1306_v35 = vld [vmem:[%s1662_s20 + $0x2b] sm:$0xff]  ;;  %v1305_v36 = vld [vmem:[%s1662_s20 + $0x23] sm:$0xff]  ;;  %v1274_v39 = vld [vmem:[%s1662_s20 + $0x39] sm:$0xff]  ;;  %s1997_s13 = scalar_lea.vmem %s2036_s2, %s1264_s6 }
  0x10   : > { %361 = vrot.lane.b32.xlu1 %v1302_v13, %s1623_s29  ;;  %v1273_v37 = vld [vmem:[%s1662_s20 + $0x31] sm:$0xff]  ;;  %v1322_v38 = vld [vmem:[%s1662_s20 + $0x24] sm:$0xff]  ;;  %v1291_v41 = vld [vmem:[%s1662_s20 + $0x3a] sm:$0xff] }
  0x11   : > { %359 = vrot.lane.b32.xlu0 %v1301_v14, %s1623_s29  ;;  %1572 = vmatpush3.bf16.msra.mxu0 %v1569_v12  ;;  %v1323_v40 = vld [vmem:[%s1662_s20 + $0x2c] sm:$0xff]  ;;  %v1308_v43 = vld [vmem:[%s1662_s20 + $0x3b] sm:$0xff]  ;;  %v1309_v52 = vld [vmem:[%s1662_s20 + $0x43] sm:$0xff] }
  0x12   : > { %1574 = vmatprep.subr.bf16.mxu0 %v1573_v25  ;;  %v1290_v42 = vld [vmem:[%s1662_s20 + $0x32] sm:$0xff]  ;;  %v1275_v45 = vld [vmem:[%s1662_s20 + $0x41] sm:$0xff]  ;;  %v1276_v47 = vld [vmem:[%s1662_s20 + $0x49] sm:$0xff] }
  0x13   : > { %v1307_v44 = vld [vmem:[%s1662_s20 + $0x33] sm:$0xff]  ;;  %v1325_v48 = vld [vmem:[%s1662_s20 + $0x3c] sm:$0xff]  ;;  %v1293_v49 = vld [vmem:[%s1662_s20 + $0x4a] sm:$0xff] }
  0x14   : > { %235 = vrot.lane.b32.xlu1 %v1269_v15, %s1622_s24  ;;  %v1324_v46 = vld [vmem:[%s1662_s20 + $0x34] sm:$0xff]  ;;  %v1292_v50 = vld [vmem:[%s1662_s20 + $0x42] sm:$0xff]  ;;  %v1310_v51 = vld [vmem:[%s1662_s20 + $0x4b] sm:$0xff] }
  0x15   : > { %423 = vrot.lane.b32.xlu0 %v1318_v16, %s1624_s30  ;;  %1576 = vmatpush3.bf16.msra.mxu0 %v1573_v25  ;;  %v1277_v53 = vld [vmem:[%s1662_s20 + $0x51] sm:$0xff]  ;;  %v1326_v54 = vld [vmem:[%s1662_s20 + $0x44] sm:$0xff]  ;;  %v1278_v55 = vld [vmem:[%s1662_s20 + $0x59] sm:$0xff] }
  0x16   : > { %1578 = vmatprep.subr.bf16.mxu0 %v1577_v30  ;;  %v1327_v56 = vld [vmem:[%s1662_s20 + $0x4c] sm:$0xff]  ;;  %v1295_v57 = vld [vmem:[%s1662_s20 + $0x5a] sm:$0xff]  ;;  %v1296_v2 = vld [vmem:[%s1662_s20 + $0x62] sm:$0xff] }
  0x17   : > { %v1294_v58 = vld [vmem:[%s1662_s20 + $0x52] sm:$0xff]  ;;  %v1312_v59 = vld [vmem:[%s1662_s20 + $0x5b] sm:$0xff]  ;;  %v1280_v63 = vld [vmem:[%s1662_s20 + $0x69] sm:$0xff] }
  0x18   : > { %237 = vrot.lane.b32.xlu1 %v1270_v17, %s1622_s24  ;;  %v1311_v60 = vld [vmem:[%s1662_s20 + $0x53] sm:$0xff]  ;;  %v1279_v61 = vld [vmem:[%s1662_s20 + $0x61] sm:$0xff]  ;;  %v1297_v1 = vld [vmem:[%s1662_s20 + $0x6a] sm:$0xff] }
  0x19   : > { %425 = vrot.lane.b32.xlu0 %v1319_v18, %s1624_s30  ;;  %1580 = vmatpush3.bf16.msra.mxu0 %v1577_v30  ;;  %v1328_v62 = vld [vmem:[%s1662_s20 + $0x54] sm:$0xff]  ;;  %v1329_v0 = vld [vmem:[%s1662_s20 + $0x5c] sm:$0xff]  ;;  %v1314_v3 = vld [vmem:[%s1662_s20 + $0x6b] sm:$0xff] }
  0x1a   : > { %v1313_v4 = vld [vmem:[%s1662_s20 + $0x63] sm:$0xff]  ;;  %v1281_v5 = vld [vmem:[%s1662_s20 + $0x71] sm:$0xff]  ;;  %v1282_v7 = vld [vmem:[%s1662_s20 + $0x79] sm:$0xff] }
  0x1b   : > { %v1330_v6 = vld [vmem:[%s1662_s20 + $0x64] sm:$0xff]  ;;  %v1331_v8 = vld [vmem:[%s1662_s20 + $0x6c] sm:$0xff]  ;;  %v1299_v9 = vld [vmem:[%s1662_s20 + $0x7a] sm:$0xff] }
  0x1c   : > { %301 = vrot.lane.b32.xlu1 %v1287_v19, %s1621_s23  ;;  %v1298_v10 = vld [vmem:[%s1662_s20 + $0x72] sm:$0xff]  ;;  %v551_v12 = vld [vmem:[%s2035_s1 + $0x60] sm:$0xff]  ;;  %v128_v26 = vld [vmem:[%s1662_s20 + $0x8] sm:$0xff] }
  0x1d   : > { %299 = vrot.lane.b32.xlu0 %v1286_v20, %s1621_s23  ;;  %v550_v11 = vld [vmem:[%s2035_s1 + $0x58] sm:$0xff]  ;;  %v127_v20 = vld [vmem:[%s1662_s20] sm:$0xff] }
  0x1e   : > { %v1581_v15 = vpack.c.bf16 %v551_v12, %v550_v11  ;;  %v1316_v16 = vld [vmem:[%s1662_s20 + $0x7b] sm:$0xff]  ;;  %v1315_v17 = vld [vmem:[%s1662_s20 + $0x73] sm:$0xff] }
  0x1f   : > { %v133_v12 = vld [vmem:[%s1662_s20 + $0x30] sm:$0xff] }
  0x20   : > { %365 = vrot.lane.b32.xlu1 %v1304_v21, %s1623_s29  ;;  %1582 = vmatprep.subr.bf16.mxu0 %v1581_v15  ;;  %v1333_v21 = vld [vmem:[%s1662_s20 + $0x7c] sm:$0xff] }
  0x21   : > { %363 = vrot.lane.b32.xlu0 %v1303_v22, %s1623_s29  ;;  %1597 = vmatprep.subr.bf16.mxu1 %v1581_v15  ;;  %v1332_v22 = vld [vmem:[%s1662_s20 + $0x74] sm:$0xff] }
  0x22   : > { %1599 = vmatpush3.bf16.msra.mxu1 %v1581_v15 }
  0x24   : > { %239 = vrot.lane.b32.xlu1 %v1271_v28, %s1622_s24 }
  0x25   : > { %427 = vrot.lane.b32.xlu0 %v1320_v29, %s1624_s30 }
  0x28   : > { %241 = vrot.lane.b32.xlu1 %v1272_v31, %s1622_s24 }
  0x29   : > { %429 = vrot.lane.b32.xlu0 %v1321_v32, %s1624_s30 }
  0x2c   : > { %305 = vrot.lane.b32.xlu1 %v1289_v33, %s1621_s23 }
  0x2d   : > { %303 = vrot.lane.b32.xlu0 %v1288_v34, %s1621_s23 }
  0x30   : > { %369 = vrot.lane.b32.xlu1 %v1306_v35, %s1623_s29 }
  0x31   : > { %367 = vrot.lane.b32.xlu0 %v1305_v36, %s1623_s29 }
  0x34   : > { %243 = vrot.lane.b32.xlu1 %v1273_v37, %s1622_s24 }
  0x35   : > { %431 = vrot.lane.b32.xlu0 %v1322_v38, %s1624_s30 }
  0x38   : > { %245 = vrot.lane.b32.xlu1 %v1274_v39, %s1622_s24 }
  0x39   : > { %433 = vrot.lane.b32.xlu0 %v1323_v40, %s1624_s30  ;;  %v129_v40 = vld [vmem:[%s1662_s20 + $0x10] sm:$0xff] }
  0x3c   : > { %309 = vrot.lane.b32.xlu1 %v1291_v41, %s1621_s23 }
  0x3d   : > { %307 = vrot.lane.b32.xlu0 %v1290_v42, %s1621_s23 }
  0x40   : > { %373 = vrot.lane.b32.xlu1 %v1308_v43, %s1623_s29 }
  0x41   : > { %371 = vrot.lane.b32.xlu0 %v1307_v44, %s1623_s29  ;;  %v130_v44 = vld [vmem:[%s1662_s20 + $0x18] sm:$0xff] }
  0x44   : > { %247 = vrot.lane.b32.xlu1 %v1275_v45, %s1622_s24 }
  0x45   : > { %435 = vrot.lane.b32.xlu0 %v1324_v46, %s1624_s30 }
  0x48   : > { %249 = vrot.lane.b32.xlu1 %v1276_v47, %s1622_s24 }
  0x49   : > { %437 = vrot.lane.b32.xlu0 %v1325_v48, %s1624_s30 }
  0x4c   : > { %313 = vrot.lane.b32.xlu1 %v1293_v49, %s1621_s23 }
  0x4d   : > { %311 = vrot.lane.b32.xlu0 %v1292_v50, %s1621_s23 }
  0x50   : > { %377 = vrot.lane.b32.xlu1 %v1310_v51, %s1623_s29 }
  0x51   : > { %375 = vrot.lane.b32.xlu0 %v1309_v52, %s1623_s29 }
  0x54   : > { %251 = vrot.lane.b32.xlu1 %v1277_v53, %s1622_s24 }
  0x55   : > { %439 = vrot.lane.b32.xlu0 %v1326_v54, %s1624_s30 }
  0x58   : > { %253 = vrot.lane.b32.xlu1 %v1278_v55, %s1622_s24 }
  0x59   : > { %441 = vrot.lane.b32.xlu0 %v1327_v56, %s1624_s30 }
  0x5c   : > { %317 = vrot.lane.b32.xlu1 %v1295_v57, %s1621_s23 }
  0x5d   : > { %315 = vrot.lane.b32.xlu0 %v1294_v58, %s1621_s23  ;;  %v131_v58 = vld [vmem:[%s1662_s20 + $0x20] sm:$0xff] }
  0x60   : > { %381 = vrot.lane.b32.xlu1 %v1312_v59, %s1623_s29 }
  0x61   : > { %379 = vrot.lane.b32.xlu0 %v1311_v60, %s1623_s29 }
  0x64   : > { %255 = vrot.lane.b32.xlu1 %v1279_v61, %s1622_s24 }
  0x65   : > { %443 = vrot.lane.b32.xlu0 %v1328_v62, %s1624_s30  ;;  %v132_v62 = vld [vmem:[%s1662_s20 + $0x28] sm:$0xff] }
  0x68   : > { %257 = vrot.lane.b32.xlu1 %v1280_v63, %s1622_s24 }
  0x69   : > { %445 = vrot.lane.b32.xlu0 %v1329_v0, %s1624_s30 }
  0x6c   : > { %321 = vrot.lane.b32.xlu1 %v1297_v1, %s1621_s23 }
  0x6d   : > { %319 = vrot.lane.b32.xlu0 %v1296_v2, %s1621_s23 }
  0x70   : > { %385 = vrot.lane.b32.xlu1 %v1314_v3, %s1623_s29 }
  0x71   : > { %383 = vrot.lane.b32.xlu0 %v1313_v4, %s1623_s29 }
  0x74   : > { %259 = vrot.lane.b32.xlu1 %v1281_v5, %s1622_s24 }
  0x75   : > { %447 = vrot.lane.b32.xlu0 %v1330_v6, %s1624_s30 }
  0x78   : > { %261 = vrot.lane.b32.xlu1 %v1282_v7, %s1622_s24 }
  0x79   : > { %449 = vrot.lane.b32.xlu0 %v1331_v8, %s1624_s30 }
  0x7a   : > { %v296_v13 = vpop.permute.xlu1 %295 }
  0x7b   : > { %v232_v14 = vpop.permute.xlu0 %231 }
  0x7c   : > { %325 = vrot.lane.b32.xlu1 %v1299_v9, %s1621_s23  ;;  %v472_v23 = vsel %vm471_vm0, %v127_v20, %v232_v14 }
  0x7d   : > { %323 = vrot.lane.b32.xlu0 %v1298_v10, %s1621_s23  ;;  %v489_v27 = vsel %vm488_vm1, %v472_v23, %v296_v13 }
  0x7e   : > { %v298_v18 = vpop.permute.xlu1 %297 }
  0x7f   : > { %v234_v19 = vpop.permute.xlu0 %233 }
  0x80   : > { %389 = vrot.lane.b32.xlu1 %v1316_v16, %s1623_s29  ;;  %v473_v28 = vsel %vm471_vm0, %v128_v26, %v234_v19  ;;  %v134_v16 = vld [vmem:[%s1662_s20 + $0x38] sm:$0xff] }
  0x81   : > { %387 = vrot.lane.b32.xlu0 %v1315_v17, %s1623_s29  ;;  %v490_v33 = vsel %vm488_vm1, %v473_v28, %v298_v18 }
  0x82   : > { %v362_v24 = vpop.permute.xlu1 %361 }
  0x83   : > { %v360_v25 = vpop.permute.xlu0 %359  ;;  %v507_v34 = vsel %vm505_vm2, %v490_v33, %v362_v24 }
  0x84   : > { %453 = vrot.lane.b32.xlu1 %v1333_v21, %s1624_s30  ;;  %v506_v29 = vsel %vm505_vm2, %v489_v27, %v360_v25 }
  0x85   : > { %451 = vrot.lane.b32.xlu0 %v1332_v22, %s1624_s30 }
  0x86   : > { %v236_v30 = vpop.permute.xlu1 %235 }
  0x87   : > { %v424_v31 = vpop.permute.xlu0 %423  ;;  %v474_v43 = vsel %vm471_vm0, %v129_v40, %v236_v30  ;;  %v135_v30 = vld [vmem:[%s1662_s20 + $0x40] sm:$0xff] }
  0x88   : > { %v523_v32 = vsel %vm522_vm3, %v506_v29, %v424_v31 }
  0x89   : > { %1473 = vmatprep.mubr.msk.f32.mxu0 %vm564_vm4, %v523_v32 }
  0x8a   : > { %v238_v35 = vpop.permute.xlu1 %237 }
  0x8b   : > { %v426_v36 = vpop.permute.xlu0 %425  ;;  %v475_v50 = vsel %vm471_vm0, %v130_v44, %v238_v35 }
  0x8c   : > { %v524_v37 = vsel %vm522_vm3, %v507_v34, %v426_v36  ;;  %v136_v34 = vld [vmem:[%s1662_s20 + $0x48] sm:$0xff] }
  0x8d   : > { %1474 = vmatmul.mubr.msk.f32.vlgmr.msra.gmra.mrb[0].mxu0 %vm564_vm4, %v524_v37 }
  0x8e   : > { %1584 = vmatpush3.bf16.msra.mxu0 %v1581_v15  ;;  %v302_v38 = vpop.permute.xlu1 %301 }
  0x8f   : > { %v300_v39 = vpop.permute.xlu0 %299  ;;  %v492_v51 = vsel %vm488_vm1, %v475_v50, %v302_v38 }
  0x90   : > { %v491_v45 = vsel %vm488_vm1, %v474_v43, %v300_v39 }
  0x92   : > { %v366_v41 = vpop.permute.xlu1 %365 }
  0x93   : > { %v364_v42 = vpop.permute.xlu0 %363  ;;  %v509_v52 = vsel %vm505_vm2, %v492_v51, %v366_v41 }
  0x94   : > { %v508_v46 = vsel %vm505_vm2, %v491_v45, %v364_v42 }
  0x96   : > { %v240_v47 = vpop.permute.xlu1 %239 }
  0x97   : > { %v428_v48 = vpop.permute.xlu0 %427  ;;  %v476_v61 = vsel %vm471_vm0, %v131_v58, %v240_v47 }
  0x98   : > { %v525_v49 = vsel %vm522_vm3, %v508_v46, %v428_v48  ;;  %v137_v48 = vld [vmem:[%s1662_s20 + $0x50] sm:$0xff] }
  0x99   : > { %1476 = vmatprep.mubr.msk.f32.mxu0 %vm564_vm4, %v525_v49 }
  0x9a   : > { %v242_v53 = vpop.permute.xlu1 %241 }
  0x9b   : > { %v430_v54 = vpop.permute.xlu0 %429  ;;  %v477_v4 = vsel %vm471_vm0, %v132_v62, %v242_v53 }
  0x9c   : > { %v526_v55 = vsel %vm522_vm3, %v509_v52, %v430_v54  ;;  %v138_v52 = vld [vmem:[%s1662_s20 + $0x58] sm:$0xff] }
  0x9d   : > { %1477 = vmatmul.mubr.msk.f32.gmra.mrb[2].mxu0 %vm564_vm4, %v526_v55 }
  0x9e   : > { %v306_v56 = vpop.permute.xlu1 %305 }
  0x9f   : > { %v304_v57 = vpop.permute.xlu0 %303  ;;  %v494_v5 = vsel %vm488_vm1, %v477_v4, %v306_v56 }
  0xa0   : > { %v493_v63 = vsel %vm488_vm1, %v476_v61, %v304_v57 }
  0xa2   : > { %v370_v59 = vpop.permute.xlu1 %369 }
  0xa3   : > { %v368_v60 = vpop.permute.xlu0 %367  ;;  %v511_v6 = vsel %vm505_vm2, %v494_v5, %v370_v59  ;;  %v139_v5 = vld [vmem:[%s1662_s20 + $0x60] sm:$0xff] }
  0xa4   : > { %v510_v0 = vsel %vm505_vm2, %v493_v63, %v368_v60 }
  0xa6   : > { %v244_v1 = vpop.permute.xlu1 %243 }
  0xa7   : > { %v432_v2 = vpop.permute.xlu0 %431  ;;  %v478_v15 = vsel %vm471_vm0, %v133_v12, %v244_v1 }
  0xa8   : > { %v527_v3 = vsel %vm522_vm3, %v510_v0, %v432_v2  ;;  %v552_v2 = vld [vmem:[%s2035_s1 + $0x68] sm:$0xff] }
  0xa9   : > { %1479 = vmatprep.mubr.msk.f32.mxu0 %vm564_vm4, %v527_v3  ;;  %v553_v3 = vld [vmem:[%s2035_s1 + $0x70] sm:$0xff] }
  0xaa   : > { %v246_v7 = vpop.permute.xlu1 %245  ;;  %v1585_v4 = vpack.c.bf16 %v553_v3, %v552_v2 }
  0xab   : > { %v434_v8 = vpop.permute.xlu0 %433  ;;  %v479_v22 = vsel %vm471_vm0, %v134_v16, %v246_v7 }
  0xac   : > { %v528_v9 = vsel %vm522_vm3, %v511_v6, %v434_v8  ;;  %1586 = vmatprep.subr.bf16.mxu0 %v1585_v4  ;;  %1598 = vmatprep.subr.bf16.mxu1 %v1585_v4 }
  0xad   : > { %1480 = vmatmul.mubr.msk.f32.gmra.mrb[4].mxu0 %vm564_vm4, %v528_v9  ;;  %1600 = vmatpush3.bf16.msra.mxu1 %v1585_v4  ;;  %v140_v9 = vld [vmem:[%s1662_s20 + $0x68] sm:$0xff] }
  0xae   : > { %v310_v10 = vpop.permute.xlu1 %309  ;;  %1588 = vmatpush3.bf16.msra.mxu0 %v1585_v4 }
  0xaf   : > { %v308_v11 = vpop.permute.xlu0 %307  ;;  %v496_v23 = vsel %vm488_vm1, %v479_v22, %v310_v10 }
  0xb0   : > { %v495_v17 = vsel %vm488_vm1, %v478_v15, %v308_v11 }
  0xb2   : > { %v374_v13 = vpop.permute.xlu1 %373 }
  0xb3   : > { %v372_v14 = vpop.permute.xlu0 %371  ;;  %v513_v24 = vsel %vm505_vm2, %v496_v23, %v374_v13  ;;  %v141_v23 = vld [vmem:[%s1662_s20 + $0x70] sm:$0xff] }
  0xb4   : > { %v512_v18 = vsel %vm505_vm2, %v495_v17, %v372_v14 }
  0xb6   : > { %v248_v19 = vpop.permute.xlu1 %247 }
  0xb7   : > { %v436_v20 = vpop.permute.xlu0 %435  ;;  %v480_v33 = vsel %vm471_vm0, %v135_v30, %v248_v19 }
  0xb8   : > { %v529_v21 = vsel %vm522_vm3, %v512_v18, %v436_v20 }
  0xb9   : > { %1482 = vmatprep.mubr.msk.f32.mxu0 %vm564_vm4, %v529_v21 }
  0xba   : > { %v250_v25 = vpop.permute.xlu1 %249 }
  0xbb   : > { %v438_v26 = vpop.permute.xlu0 %437  ;;  %v481_v40 = vsel %vm471_vm0, %v136_v34, %v250_v25 }
  0xbc   : > { %v530_v27 = vsel %vm522_vm3, %v513_v24, %v438_v26  ;;  %v142_v24 = vld [vmem:[%s1662_s20 + $0x78] sm:$0xff] }
  0xbd   : > { %1483 = vmatmul.mubr.msk.f32.gmra.mrb[6].mxu0 %vm564_vm4, %v530_v27 }
  0xbe   : > { %v314_v28 = vpop.permute.xlu1 %313 }
  0xbf   : > { %v312_v29 = vpop.permute.xlu0 %311  ;;  %v498_v41 = vsel %vm488_vm1, %v481_v40, %v314_v28  ;;  %v1930_v40 = vld [vmem:[%s2035_s1 + $0x50] ss:$0 sm:$0xff] }
  0xc0   : > { %v497_v35 = vsel %vm488_vm1, %v480_v33, %v312_v29 }
  0xc2   : > { %v378_v31 = vpop.permute.xlu1 %377 }
  0xc3   : > { %v376_v32 = vpop.permute.xlu0 %375  ;;  %v515_v42 = vsel %vm505_vm2, %v498_v41, %v378_v31 }
  0xc4   : > { %v514_v36 = vsel %vm505_vm2, %v497_v35, %v376_v32 }
  0xc6   : > { %v252_v37 = vpop.permute.xlu1 %251 }
  0xc7   : > { %v440_v38 = vpop.permute.xlu0 %439  ;;  %v482_v51 = vsel %vm471_vm0, %v137_v48, %v252_v37  ;;  %v555_v37 = vld [vmem:[%s2035_s1 + $0x80] sm:$0xff] }
  0xc8   : > { %v531_v39 = vsel %vm522_vm3, %v514_v36, %v440_v38  ;;  %v556_v38 = vld [vmem:[%s2035_s1 + $0x88] sm:$0xff] }
  0xc9   : > { %1485 = vmatprep.mubr.msk.f32.mxu0 %vm564_vm4, %v531_v39  ;;  %v1589_v39 = vpack.c.bf16 %v556_v38, %v555_v37 }
  0xca   : > { %v254_v43 = vpop.permute.xlu1 %253 }
  0xcb   : > { %v442_v44 = vpop.permute.xlu0 %441  ;;  %v483_v58 = vsel %vm471_vm0, %v138_v52, %v254_v43  ;;  %1590 = vmatprep.subr.bf16.mxu1 %v1589_v39 }
  0xcc   : > { %v532_v45 = vsel %vm522_vm3, %v515_v42, %v442_v44 }
  0xcd   : > { %1486 = vmatmul.mubr.msk.f32.gmra.mrb[8].mxu0 %vm564_vm4, %v532_v45 }
  0xce   : > { %v318_v46 = vpop.permute.xlu1 %317 }
  0xcf   : > { %v316_v47 = vpop.permute.xlu0 %315  ;;  %v500_v59 = vsel %vm488_vm1, %v483_v58, %v318_v46 }
  0xd0   : > { %v499_v53 = vsel %vm488_vm1, %v482_v51, %v316_v47 }
  0xd2   : > { %v382_v49 = vpop.permute.xlu1 %381 }
  0xd3   : > { %v380_v50 = vpop.permute.xlu0 %379  ;;  %v517_v60 = vsel %vm505_vm2, %v500_v59, %v382_v49 }
  0xd4   : > { %v516_v54 = vsel %vm505_vm2, %v499_v53, %v380_v50 }
  0xd6   : > { %v256_v55 = vpop.permute.xlu1 %255 }
  0xd7   : > { %v444_v56 = vpop.permute.xlu0 %443  ;;  %v484_v8 = vsel %vm471_vm0, %v139_v5, %v256_v55 }
  0xd8   : > { %v533_v57 = vsel %vm522_vm3, %v516_v54, %v444_v56 }
  0xd9   : > { %1488 = vmatprep.mubr.msk.f32.mxu0 %vm564_vm4, %v533_v57 }
  0xda   : > { %v258_v61 = vpop.permute.xlu1 %257 }
  0xdb   : > { %v446_v62 = vpop.permute.xlu0 %445  ;;  %v485_v15 = vsel %vm471_vm0, %v140_v9, %v258_v61 }
  0xdc   : > { %v534_v63 = vsel %vm522_vm3, %v517_v60, %v446_v62 }
  0xdd   : > { %1489 = vmatmul.mubr.msk.f32.gmra.mrb[10].mxu0 %vm564_vm4, %v534_v63 }
  0xde   : > { %v322_v0 = vpop.permute.xlu1 %321 }
  0xdf   : > { %v320_v1 = vpop.permute.xlu0 %319  ;;  %v502_v16 = vsel %vm488_vm1, %v485_v15, %v322_v0 }
  0xe0   : > { %v501_v10 = vsel %vm488_vm1, %v484_v8, %v320_v1 }
  0xe2   : > { %v386_v6 = vpop.permute.xlu1 %385 }
  0xe3   : > { %v384_v7 = vpop.permute.xlu0 %383  ;;  %v519_v17 = vsel %vm505_vm2, %v502_v16, %v386_v6 }
  0xe4   : > { %v518_v11 = vsel %vm505_vm2, %v501_v10, %v384_v7 }
  0xe6   : > { %v260_v12 = vpop.permute.xlu1 %259 }
  0xe7   : > { %v448_v13 = vpop.permute.xlu0 %447  ;;  %v486_v27 = vsel %vm471_vm0, %v141_v23, %v260_v12 }
  0xe8   : > { %v535_v14 = vsel %vm522_vm3, %v518_v11, %v448_v13  ;;  %v557_v13 = vld [vmem:[%s2035_s1 + $0x90] sm:$0xff] }
  0xe9   : > { %1491 = vmatprep.mubr.msk.f32.mxu0 %vm564_vm4, %v535_v14  ;;  %v558_v14 = vld [vmem:[%s2035_s1 + $0x98] sm:$0xff] }
  0xea   : > { %v262_v18 = vpop.permute.xlu1 %261  ;;  %v1593_v15 = vpack.c.bf16 %v558_v14, %v557_v13  ;;  %v1368_v13 = vld [vmem:[%s2035_s1 + $0xa0] ss:$0 sm:$0xff] }
  0xeb   : > { %v450_v19 = vpop.permute.xlu0 %449  ;;  %v487_v28 = vsel %vm471_vm0, %v142_v24, %v262_v18 }
  0xec   : > { %v536_v20 = vsel %vm522_vm3, %v519_v17, %v450_v19 }
  0xed   : > { %1492 = vmatmul.mubr.msk.f32.gmra.mrb[12].mxu0 %vm564_vm4, %v536_v20 }
  0xee   : > { %v326_v21 = vpop.permute.xlu1 %325 }
  0xef   : > { %v324_v22 = vpop.permute.xlu0 %323  ;;  %v504_v29 = vsel %vm488_vm1, %v487_v28, %v326_v21  ;;  %v1351_v28 = vld [vmem:[%s2035_s1 + $0x78] ss:$0 sm:$0xff] }
  0xf0   : > { %v503_v30 = vsel %vm488_vm1, %v486_v27, %v324_v22 }
  0xf2   : > { %v390_v25 = vpop.permute.xlu1 %389 }
  0xf3   : > { %v388_v26 = vpop.permute.xlu0 %387  ;;  %v521_v31 = vsel %vm505_vm2, %v504_v29, %v390_v25 }
  0xf4   : > { %v520_v32 = vsel %vm505_vm2, %v503_v30, %v388_v26 }
  0xf6   : > { %v454_v33 = vpop.permute.xlu1 %453 }
  0xf7   : > { %v452_v34 = vpop.permute.xlu0 %451  ;;  %v538_v35 = vsel %vm522_vm3, %v521_v31, %v454_v33 }
  0xf8   : > { %v537_v36 = vsel %vm522_vm3, %v520_v32, %v452_v34 }
  0xf9   : > { %1494 = vmatprep.mubr.msk.f32.mxu0 %vm564_vm4, %v537_v36 }
  0xfa   : > { %1495 = vmatmul.mubr.msk.f32.gmra.mrb[14].mxu0 %vm564_vm4, %v538_v35 }
 0x160   : > { %v1475_v41 = vpop.f32.mrb[0].mxu0 }
 0x161   : > { %v685_v42 = vadd.f32 %v1475_v41, %v1930_v40  ;;  %v679_v43 = vpop.f32.mrb[1].mxu0 }
 0x162   : > { %v680_v44 = vadd.f32 %v1930_v40, %v679_v43 }
 0x163   : > { %v759_v46 = vmax.f32 %v685_v42, 0.0 }
 0x164   : > { %v758_v45 = vmax.f32 %v680_v44, 0.0 }
 0x166   : > { %1505 = vmatprep.mubr.msk.f32.mxu0 %vm488_vm1, %v758_v45 }
 0x167   : > { %1506 = vmatmul.mubr.msk.f32.vlgmr.msra.gmra.mrb[16].mxu0 %vm488_vm1, %v759_v46 }
 0x170   : > { %v1478_v47 = vpop.f32.mrb[2].mxu0 }
 0x171   : > { %v695_v48 = vadd.f32 %v1478_v47, %v1930_v40  ;;  %v689_v49 = vpop.f32.mrb[3].mxu0 }
 0x172   : > { %v690_v50 = vadd.f32 %v1930_v40, %v689_v49 }
 0x173   : > { %v761_v52 = vmax.f32 %v695_v48, 0.0 }
 0x174   : > { %v760_v51 = vmax.f32 %v690_v50, 0.0 }
 0x176   : > { %1508 = vmatprep.mubr.msk.f32.mxu0 %vm488_vm1, %v760_v51 }
 0x177   : > { %1509 = vmatmul.mubr.msk.f32.gmra.mrb[18].mxu0 %vm488_vm1, %v761_v52 }
 0x180   : > { %v1481_v53 = vpop.f32.mrb[4].mxu0 }
 0x181   : > { %v705_v54 = vadd.f32 %v1481_v53, %v1930_v40  ;;  %v699_v55 = vpop.f32.mrb[5].mxu0 }
 0x182   : > { %v700_v56 = vadd.f32 %v1930_v40, %v699_v55 }
 0x183   : > { %v763_v58 = vmax.f32 %v705_v54, 0.0 }
 0x184   : > { %v762_v57 = vmax.f32 %v700_v56, 0.0 }
 0x186   : > { %1511 = vmatprep.mubr.msk.f32.mxu1 %vm488_vm1, %v762_v57 }
 0x187   : > { %1512 = vmatmul.mubr.msk.f32.vlgmr.msra.gmra.mrb[0].mxu1 %vm488_vm1, %v763_v58 }
 0x188   : > { %1592 = vmatpush3.bf16.msra.mxu1 %v1589_v39 }
 0x189   : > { %1594 = vmatprep.subr.bf16.mxu1 %v1593_v15 }
 0x18c   : > { %1596 = vmatpush3.bf16.msra.mxu1 %v1593_v15 }
 0x190   : > { %v1484_v59 = vpop.f32.mrb[6].mxu0 }
 0x191   : > { %v715_v60 = vadd.f32 %v1484_v59, %v1930_v40  ;;  %v709_v61 = vpop.f32.mrb[7].mxu0 }
 0x192   : > { %v710_v62 = vadd.f32 %v1930_v40, %v709_v61 }
 0x193   : > { %v765_v0 = vmax.f32 %v715_v60, 0.0 }
 0x194   : > { %v764_v63 = vmax.f32 %v710_v62, 0.0 }
 0x196   : > { %1514 = vmatprep.mubr.msk.f32.mxu1 %vm488_vm1, %v764_v63 }
 0x197   : > { %1515 = vmatmul.mubr.msk.f32.gmra.mrb[2].mxu1 %vm488_vm1, %v765_v0 }
 0x1a0   : > { %v1487_v1 = vpop.f32.mrb[8].mxu0 }
 0x1a1   : > { %v725_v2 = vadd.f32 %v1487_v1, %v1930_v40  ;;  %v719_v3 = vpop.f32.mrb[9].mxu0 }
 0x1a2   : > { %v720_v4 = vadd.f32 %v1930_v40, %v719_v3 }
 0x1a3   : > { %v767_v6 = vmax.f32 %v725_v2, 0.0 }
 0x1a4   : > { %v766_v5 = vmax.f32 %v720_v4, 0.0 }
 0x1a6   : > { %1517 = vmatprep.mubr.msk.f32.mxu1 %vm488_vm1, %v766_v5 }
 0x1a7   : > { %1518 = vmatmul.mubr.msk.f32.gmra.mrb[4].mxu1 %vm488_vm1, %v767_v6 }
 0x1b0   : > { %v1490_v7 = vpop.f32.mrb[10].mxu0 }
 0x1b1   : > { %v735_v8 = vadd.f32 %v1490_v7, %v1930_v40  ;;  %v729_v9 = vpop.f32.mrb[11].mxu0 }
 0x1b2   : > { %v730_v10 = vadd.f32 %v1930_v40, %v729_v9 }
 0x1b3   : > { %v769_v12 = vmax.f32 %v735_v8, 0.0 }
 0x1b4   : > { %v768_v11 = vmax.f32 %v730_v10, 0.0 }
 0x1b6   : > { %1520 = vmatprep.mubr.msk.f32.mxu1 %vm488_vm1, %v768_v11 }
 0x1b7   : > { %1521 = vmatmul.mubr.msk.f32.gmra.mrb[6].mxu1 %vm488_vm1, %v769_v12 }
 0x1c0   : > { %v1493_v16 = vpop.f32.mrb[12].mxu0 }
 0x1c1   : > { %v745_v17 = vadd.f32 %v1493_v16, %v1930_v40  ;;  %v739_v18 = vpop.f32.mrb[13].mxu0 }
 0x1c2   : > { %v740_v19 = vadd.f32 %v1930_v40, %v739_v18 }
 0x1c3   : > { %v771_v21 = vmax.f32 %v745_v17, 0.0 }
 0x1c4   : > { %v770_v20 = vmax.f32 %v740_v19, 0.0 }
 0x1c6   : > { %1523 = vmatprep.mubr.msk.f32.mxu1 %vm488_vm1, %v770_v20 }
 0x1c7   : > { %1524 = vmatmul.mubr.msk.f32.gmra.mrb[8].mxu1 %vm488_vm1, %v771_v21 }
 0x1cd   : > { %v1496_v22 = vpop.f32.mrb[14].mxu0 }
 0x1ce   : > { %v755_v23 = vadd.f32 %v1496_v22, %v1930_v40  ;;  %v749_v24 = vpop.f32.mrb[15].mxu0 }
 0x1cf   : > { %v750_v25 = vadd.f32 %v1930_v40, %v749_v24 }
 0x1d0   : > { %v773_v27 = vmax.f32 %v755_v23, 0.0 }
 0x1d1   : > { %v772_v26 = vmax.f32 %v750_v25, 0.0 }
 0x1d3   : > { %1526 = vmatprep.mubr.msk.f32.mxu1 %vm488_vm1, %v772_v26 }
 0x1d4   : > { %1527 = vmatmul.mubr.msk.f32.gmra.mrb[10].mxu1 %vm488_vm1, %v773_v27 }
 0x23a   : > { %v1507_v29 = vpop.f32.mrb[16].mxu0 }
 0x23b   : > { %v898_v30 = vadd.f32 %v1507_v29, %v1351_v28  ;;  %v892_v31 = vpop.f32.mrb[17].mxu0 }
 0x23c   : > { %v893_v32 = vadd.f32 %v1351_v28, %v892_v31 }
 0x23d   : > { %v972_v34 = vmax.f32 %v898_v30, 0.0 }
 0x23e   : > { %v971_v33 = vmax.f32 %v893_v32, 0.0 }
 0x240   : > { %1537 = vmatprep.mubr.msk.f32.mxu1 %vm488_vm1, %v971_v33 }
 0x241   : > { %1538 = vmatmul.mubr.msk.f32.vlgmr.msra.gmra.mrb[12].mxu1 %vm488_vm1, %v972_v34 }
 0x24a   : > { %v1510_v35 = vpop.f32.mrb[18].mxu0 }
 0x24b   : > { %v908_v36 = vadd.f32 %v1510_v35, %v1351_v28  ;;  %v902_v37 = vpop.f32.mrb[19].mxu0 }
 0x24c   : > { %v903_v38 = vadd.f32 %v1351_v28, %v902_v37 }
 0x24d   : > { %v974_v40 = vmax.f32 %v908_v36, 0.0 }
 0x24e   : > { %v973_v39 = vmax.f32 %v903_v38, 0.0 }
 0x250   : > { %1540 = vmatprep.mubr.msk.f32.mxu1 %vm488_vm1, %v973_v39 }
 0x251   : > { %1541 = vmatmul.mubr.msk.f32.gmra.mrb[14].mxu1 %vm488_vm1, %v974_v40 }
 0x25a   : > { %v1513_v41 = vpop.f32.mrb[0].mxu1 }
 0x25b   : > { %v918_v42 = vadd.f32 %v1513_v41, %v1351_v28  ;;  %v912_v43 = vpop.f32.mrb[1].mxu1 }
 0x25c   : > { %v913_v44 = vadd.f32 %v1351_v28, %v912_v43 }
 0x25d   : > { %v976_v46 = vmax.f32 %v918_v42, 0.0 }
 0x25e   : > { %v975_v45 = vmax.f32 %v913_v44, 0.0 }
 0x260   : > { %1543 = vmatprep.mubr.msk.f32.mxu1 %vm488_vm1, %v975_v45 }
 0x261   : > { %1544 = vmatmul.mubr.msk.f32.gmra.mrb[16].mxu1 %vm488_vm1, %v976_v46 }
 0x26a   : > { %v1516_v47 = vpop.f32.mrb[2].mxu1 }
 0x26b   : > { %v928_v48 = vadd.f32 %v1516_v47, %v1351_v28  ;;  %v922_v49 = vpop.f32.mrb[3].mxu1 }
 0x26c   : > { %v923_v50 = vadd.f32 %v1351_v28, %v922_v49 }
 0x26d   : > { %v978_v52 = vmax.f32 %v928_v48, 0.0 }
 0x26e   : > { %v977_v51 = vmax.f32 %v923_v50, 0.0 }
 0x270   : > { %1546 = vmatprep.mubr.msk.f32.mxu1 %vm488_vm1, %v977_v51 }
 0x271   : > { %1547 = vmatmul.mubr.msk.f32.gmra.mrb[18].mxu1 %vm488_vm1, %v978_v52 }
 0x27a   : > { %v1519_v53 = vpop.f32.mrb[4].mxu1 }
 0x27b   : > { %v938_v54 = vadd.f32 %v1519_v53, %v1351_v28  ;;  %v932_v55 = vpop.f32.mrb[5].mxu1 }
 0x27c   : > { %v933_v56 = vadd.f32 %v1351_v28, %v932_v55 }
 0x27d   : > { %v980_v58 = vmax.f32 %v938_v54, 0.0 }
 0x27e   : > { %v979_v57 = vmax.f32 %v933_v56, 0.0 }
 0x280   : > { %1549 = vmatprep.mubr.msk.f32.mxu1 %vm488_vm1, %v979_v57 }
 0x281   : > { %1550 = vmatmul.mubr.msk.f32.gmra.mrb[20].mxu1 %vm488_vm1, %v980_v58 }
 0x28a   : > { %v1522_v59 = vpop.f32.mrb[6].mxu1 }
 0x28b   : > { %v948_v60 = vadd.f32 %v1522_v59, %v1351_v28  ;;  %v942_v61 = vpop.f32.mrb[7].mxu1 }
 0x28c   : > { %v943_v62 = vadd.f32 %v1351_v28, %v942_v61 }
 0x28d   : > { %v982_v0 = vmax.f32 %v948_v60, 0.0 }
 0x28e   : > { %v981_v63 = vmax.f32 %v943_v62, 0.0 }
 0x290   : > { %1552 = vmatprep.mubr.msk.f32.mxu1 %vm488_vm1, %v981_v63 }
 0x291   : > { %1553 = vmatmul.mubr.msk.f32.gmra.mrb[22].mxu1 %vm488_vm1, %v982_v0 }
 0x29a   : > { %v1525_v1 = vpop.f32.mrb[8].mxu1 }
 0x29b   : > { %v958_v2 = vadd.f32 %v1525_v1, %v1351_v28  ;;  %v952_v3 = vpop.f32.mrb[9].mxu1 }
 0x29c   : > { %v953_v4 = vadd.f32 %v1351_v28, %v952_v3 }
 0x29d   : > { %v984_v6 = vmax.f32 %v958_v2, 0.0 }
 0x29e   : > { %v983_v5 = vmax.f32 %v953_v4, 0.0 }
 0x2a0   : > { %1555 = vmatprep.mubr.msk.f32.mxu1 %vm488_vm1, %v983_v5 }
 0x2a1   : > { %1556 = vmatmul.mubr.msk.f32.gmra.mrb[24].mxu1 %vm488_vm1, %v984_v6 }
 0x2a7   : > { %v1528_v7 = vpop.f32.mrb[10].mxu1 }
 0x2a8   : > { %v968_v8 = vadd.f32 %v1528_v7, %v1351_v28  ;;  %v962_v9 = vpop.f32.mrb[11].mxu1 }
 0x2a9   : > { %v963_v10 = vadd.f32 %v1351_v28, %v962_v9 }
 0x2aa   : > { %v986_v12 = vmax.f32 %v968_v8, 0.0 }
 0x2ab   : > { %v985_v11 = vmax.f32 %v963_v10, 0.0 }
 0x2ad   : > { %1558 = vmatprep.mubr.msk.f32.mxu1 %vm488_vm1, %v985_v11 }
 0x2ae   : > { %1559 = vmatmul.mubr.msk.f32.gmra.mrb[26].mxu1 %vm488_vm1, %v986_v12 }
 0x314   : > { %v1539_v14 = vpop.f32.mrb[12].mxu1 }
 0x315   : > { %v1111_v15 = vadd.f32 %v1539_v14, %v1368_v13  ;;  %v1105_v16 = vpop.f32.mrb[13].mxu1 }
 0x316   : > { %v1106_v17 = vadd.f32 %v1368_v13, %v1105_v16 }
 0x317   : > { %1186 = vst.msk [vmem:[%s1997_s13 + $0x8] sm:$0xff] %vm1184_vm5, %v1111_v15 }
 0x318   : > { %1185 = vst.msk [vmem:[%s1997_s13] sm:$0xff] %vm1184_vm5, %v1106_v17 }
 0x324   : > { %v1542_v18 = vpop.f32.mrb[14].mxu1 }
 0x325   : > { %v1121_v19 = vadd.f32 %v1542_v18, %v1368_v13  ;;  %v1115_v20 = vpop.f32.mrb[15].mxu1 }
 0x326   : > { %v1116_v21 = vadd.f32 %v1368_v13, %v1115_v20 }
 0x327   : > { %1188 = vst.msk [vmem:[%s1997_s13 + $0x18] sm:$0xff] %vm1184_vm5, %v1121_v19 }
 0x328   : > { %1187 = vst.msk [vmem:[%s1997_s13 + $0x10] sm:$0xff] %vm1184_vm5, %v1116_v21 }
 0x334   : > { %v1545_v22 = vpop.f32.mrb[16].mxu1 }
 0x335   : > { %v1131_v23 = vadd.f32 %v1545_v22, %v1368_v13  ;;  %v1125_v24 = vpop.f32.mrb[17].mxu1 }
 0x336   : > { %v1126_v25 = vadd.f32 %v1368_v13, %v1125_v24 }
 0x337   : > { %1190 = vst.msk [vmem:[%s1997_s13 + $0x28] sm:$0xff] %vm1184_vm5, %v1131_v23 }
 0x338   : > { %1189 = vst.msk [vmem:[%s1997_s13 + $0x20] sm:$0xff] %vm1184_vm5, %v1126_v25 }
 0x344   : > { %v1548_v26 = vpop.f32.mrb[18].mxu1 }
 0x345   : > { %v1141_v27 = vadd.f32 %v1548_v26, %v1368_v13  ;;  %v1135_v28 = vpop.f32.mrb[19].mxu1 }
 0x346   : > { %v1136_v29 = vadd.f32 %v1368_v13, %v1135_v28 }
 0x347   : > { %1192 = vst.msk [vmem:[%s1997_s13 + $0x38] sm:$0xff] %vm1184_vm5, %v1141_v27 }
 0x348   : > { %1191 = vst.msk [vmem:[%s1997_s13 + $0x30] sm:$0xff] %vm1184_vm5, %v1136_v29 }
 0x354   : > { %v1551_v30 = vpop.f32.mrb[20].mxu1 }
 0x355   : > { %v1151_v31 = vadd.f32 %v1551_v30, %v1368_v13  ;;  %v1145_v32 = vpop.f32.mrb[21].mxu1 }
 0x356   : > { %v1146_v33 = vadd.f32 %v1368_v13, %v1145_v32 }
 0x357   : > { %1194 = vst.msk [vmem:[%s1997_s13 + $0x48] sm:$0xff] %vm1184_vm5, %v1151_v31 }
 0x358   : > { %1193 = vst.msk [vmem:[%s1997_s13 + $0x40] sm:$0xff] %vm1184_vm5, %v1146_v33 }
 0x364   : > { %v1554_v34 = vpop.f32.mrb[22].mxu1 }
 0x365   : > { %v1161_v35 = vadd.f32 %v1554_v34, %v1368_v13  ;;  %v1155_v36 = vpop.f32.mrb[23].mxu1 }
 0x366   : > { %v1156_v37 = vadd.f32 %v1368_v13, %v1155_v36 }
 0x367   : > { %1196 = vst.msk [vmem:[%s1997_s13 + $0x58] sm:$0xff] %vm1184_vm5, %v1161_v35 }
 0x368   : > { %1195 = vst.msk [vmem:[%s1997_s13 + $0x50] sm:$0xff] %vm1184_vm5, %v1156_v37 }
 0x374   : > { %v1557_v38 = vpop.f32.mrb[24].mxu1 }
 0x375   : > { %v1171_v39 = vadd.f32 %v1557_v38, %v1368_v13  ;;  %v1165_v40 = vpop.f32.mrb[25].mxu1 }
 0x376   : > { %v1166_v41 = vadd.f32 %v1368_v13, %v1165_v40 }
 0x377   : > { %1198 = vst.msk [vmem:[%s1997_s13 + $0x68] sm:$0xff] %vm1184_vm5, %v1171_v39 }
 0x378   : > { %1197 = vst.msk [vmem:[%s1997_s13 + $0x60] sm:$0xff] %vm1184_vm5, %v1166_v41 }
 0x381   : > { %v1560_v42 = vpop.f32.mrb[26].mxu1 }
 0x382   : > { %v1181_v43 = vadd.f32 %v1560_v42, %v1368_v13  ;;  %v1175_v44 = vpop.f32.mrb[27].mxu1 }
 0x383   : > { %v1176_v45 = vadd.f32 %v1368_v13, %v1175_v44 }
 0x384   : > { %1200 = vst.msk [vmem:[%s1997_s13 + $0x78] sm:$0xff] %vm1184_vm5, %v1181_v43 }
 0x385   : > { %1199 = vst.msk [vmem:[%s1997_s13 + $0x70] sm:$0xff] %vm1184_vm5, %v1176_v45 }
 0x386 PF: > { %s12_s9 = sadd.s32 1, %s1619_s9  }
 0x387   : > { %p9_p4 = scmp.ge.s32.totalorder %s12_s9, 6  }
 0x389   :  { %11 = sbr.rel (!%p9_p4) target bundleno = 1 (0x1), region = 60 }

</bundles_post_ra>
